<compile_context>
chip_gen: v6e
topology: v6e:2x2x1
jax: 0.10.0
libtpu: 0.0.40
codegen_flags: <defaults>
</compile_context>

<pallas_src>
import jax
import jax.numpy as jnp
from jax import lax
from jax.experimental import pallas as pl
from jax.experimental.pallas import tpu as pltpu

EPS = 1e-5


def _round_up(x, m):
    return (x + m - 1) // m * m


def _vmem_capacity_bytes():
    try:
        return int(pltpu.get_tpu_info().vmem_capacity_bytes)
    except Exception:
        return 128 << 20   # conservative default (v5e/v6e-class)


def _make_kernel(inv_n, eps, td):
    def kernel(x1_ref, x2_ref, w_ref, gamma_ref, beta_ref, b_ref,
               out_add_ref, out_ref, ln_ref):
        j = pl.program_id(1)

        # add + LayerNorm once per row tile (first D tile only); cache in VMEM.
        @pl.when(j == 0)
        def _():
            x = x1_ref[...] + x2_ref[...]                        # (tm, n_pad)
            out_add_ref[...] = x
            xf = x.astype(jnp.float32)
            # One-pass statistics in f32: mean = s1/N, var = s2/N - mean^2.
            # (Padded columns are zero and do not perturb the true-N divisor.)
            s1 = jnp.sum(xf, axis=-1, keepdims=True)
            s2 = jnp.sum(xf * xf, axis=-1, keepdims=True)
            mean = s1 * inv_n
            var = s2 * inv_n - mean * mean
            rstd = lax.rsqrt(var + eps)
            gamma = gamma_ref[...].astype(jnp.float32)           # (1, n_pad)
            beta = beta_ref[...].astype(jnp.float32)             # (1, n_pad)
            ln = (xf - mean) * rstd * gamma + beta
            ln_ref[...] = ln.astype(ln_ref.dtype)

        # (tm, n_pad) @ (n_pad, td) on the MXU with f32 accumulation.
        y = jnp.dot(ln_ref[...], w_ref[...],
                    preferred_element_type=jnp.float32)
        # Bias is resident in VMEM as (1, d_pad) f32; slice the current tile.
        start = pl.multiple_of(j * td, td)
        y = y + b_ref[:, pl.ds(start, td)]
        out_ref[...] = y.astype(out_ref.dtype)

    return kernel


class AddLnMatmulTPU:
    """Fused (x1 + x2) -> LayerNorm -> @ w + b.

    Parameters are padded / cast exactly once at construction (hoisted out of
    the per-call path).  __call__(x1, x2) returns (out_add, out).
    """

    def __init__(self, w, b, gamma, beta, *, matmul_dtype=jnp.bfloat16):
        w = jnp.asarray(w)
        b = jnp.asarray(b)
        gamma = jnp.asarray(gamma)
        beta = jnp.asarray(beta)
        N, D = w.shape
        assert gamma.shape == (N,) and beta.shape == (N,) and b.shape == (D,)

        self.N, self.D = N, D
        self.matmul_dtype = matmul_dtype
        self.mm_bytes = jnp.dtype(matmul_dtype).itemsize
        self.n_pad = _round_up(N, 128)
        self.d_pad = _round_up(D, 128)

        # ---- generation-aware VMEM budget / row-tile cap -------------------
        cap = _vmem_capacity_bytes()
        if cap >= (100 << 20):            # v5e / v6e : 128 MiB physical VMEM
            self.vmem_target = 96 << 20
            self.vmem_limit = 100 << 20
            self.tm_cap = 768
        else:                             # v7x : 64 MiB physical VMEM
            self.vmem_target = 44 << 20
            self.vmem_limit = 52 << 20
            self.tm_cap = 384

        # Weight lane tile: largest of {512, 256, 128} dividing d_pad whose
        # double-buffered (n_pad, td) tile stays within 1/3 of the budget.
        td = 128
        for cand in (512, 256, 128):
            if (self.d_pad % cand == 0 and
                    2 * self.n_pad * cand * self.mm_bytes <= self.vmem_target // 3):
                td = cand
                break
        self.td = min(td, self.d_pad)

        # ---- one-time parameter padding / casting --------------------------
        if self.n_pad == N and self.d_pad == D:
            w_p = w
        else:
            w_p = jnp.pad(w, ((0, self.n_pad - N), (0, self.d_pad - D)))
        self.w_p = w_p.astype(matmul_dtype)

        if self.n_pad == N:
            gamma_p, beta_p = gamma, beta
        else:
            gamma_p = jnp.pad(gamma, (0, self.n_pad - N))
            beta_p = jnp.pad(beta, (0, self.n_pad - N))
        self.gamma_p = gamma_p.reshape(1, self.n_pad)
        self.beta_p = beta_p.reshape(1, self.n_pad)

        b_f32 = b.astype(jnp.float32)                 # hoisted f32 cast of bias
        if self.d_pad != D:
            b_f32 = jnp.pad(b_f32, (0, self.d_pad - D))
        self.b_p = b_f32.reshape(1, self.d_pad)

    def __call__(self, x1, x2):
        assert x1.shape == x2.shape and x1.dtype == x2.dtype
        orig_shape = x1.shape
        N, D = self.N, self.D
        assert orig_shape[-1] == N
        n_pad, d_pad, td = self.n_pad, self.d_pad, self.td
        mm_bytes = self.mm_bytes
        x_bytes = jnp.dtype(x1.dtype).itemsize

        x1f = x1.reshape(-1, N)
        x2f = x2.reshape(-1, N)
        R = x1f.shape[0]

        # ---- row tile from the per-generation VMEM budget ------------------
        fixed = (2 * n_pad * td * mm_bytes                  # weight (double-buffered)
                 + 4 * n_pad * 4 + d_pad * 4)               # gamma/beta/bias (resident)
        per_row = n_pad * (6 * x_bytes + mm_bytes) + 2 * td * x_bytes
        avail = max(self.vmem_target - fixed, 8 * per_row)
        tm = min(avail // per_row, self.tm_cap)
        # Align to MXU pass height: multiples of 256, else 128, else 8.
        if tm >= 256:
            tm = tm // 256 * 256
        elif tm >= 128:
            tm = 128
        else:
            tm = max(8, tm // 8 * 8)
        r8 = _round_up(R, 8)
        if tm >= r8:
            tm = r8
        tm = int(tm)
        r_pad = _round_up(R, tm)

        # Zero-pad activations only when actually needed (skip when aligned).
        # Padded gamma/beta/w are zero and the LN divisor stays 1/N, so the
        # original region is exact; padded rows/cols are sliced off below.
        if r_pad != R or n_pad != N:
            x1f = jnp.pad(x1f, ((0, r_pad - R), (0, n_pad - N)))
            x2f = jnp.pad(x2f, ((0, r_pad - R), (0, n_pad - N)))

        grid = (r_pad // tm, d_pad // td)

        cost = pl.CostEstimate(
            flops=int(2 * r_pad * n_pad * d_pad + 8 * r_pad * n_pad),
            transcendentals=int(r_pad),
            bytes_accessed=int(3 * R * N * x_bytes                     # x1, x2, out_add
                               + grid[0] * n_pad * d_pad * mm_bytes    # weight re-reads
                               + R * D * x_bytes),                     # out
        )

        kernel = _make_kernel(float(1.0 / N), float(EPS), td)

        out_add_p, out_p = pl.pallas_call(
            kernel,
            out_shape=(
                jax.ShapeDtypeStruct((r_pad, n_pad), x1.dtype),   # out_add
                jax.ShapeDtypeStruct((r_pad, d_pad), x1.dtype),   # out
            ),
            grid_spec=pltpu.PrefetchScalarGridSpec(
                num_scalar_prefetch=0,
                grid=grid,
                in_specs=[
                    pl.BlockSpec((tm, n_pad), lambda r, j: (r, 0)),    # x1
                    pl.BlockSpec((tm, n_pad), lambda r, j: (r, 0)),    # x2
                    pl.BlockSpec((n_pad, td), lambda r, j: (0, j)),    # w (D-tiled)
                    pl.BlockSpec((1, n_pad), lambda r, j: (0, 0)),     # gamma (resident)
                    pl.BlockSpec((1, n_pad), lambda r, j: (0, 0)),     # beta  (resident)
                    pl.BlockSpec((1, d_pad), lambda r, j: (0, 0)),     # bias  (resident, f32)
                ],
                out_specs=[
                    pl.BlockSpec((tm, n_pad), lambda r, j: (r, 0)),    # out_add (resident over j)
                    pl.BlockSpec((tm, td), lambda r, j: (r, j)),       # out
                ],
                scratch_shapes=[pltpu.VMEM((tm, n_pad), self.matmul_dtype)],  # cached ln tile
            ),
            compiler_params=pltpu.CompilerParams(
                dimension_semantics=("parallel", "arbitrary"),
                vmem_limit_bytes=int(self.vmem_limit)),
            cost_estimate=cost,
        )(x1f, x2f, self.w_p, self.gamma_p, self.beta_p, self.b_p)

        out_add = out_add_p[:R, :N].reshape(orig_shape)
        out = out_p[:R, :D].reshape(orig_shape[:-1] + (D,))
        return out_add, out


def add_ln_matmul(x1, x2, w, b, gamma, beta, *, matmul_dtype=jnp.bfloat16):
    """One-off convenience wrapper (re-prepares parameters every call)."""
    return AddLnMatmulTPU(w, b, gamma, beta, matmul_dtype=matmul_dtype)(x1, x2)


def _reference(x1, x2, w, b, gamma, beta):
    x = x1.astype(jnp.float32) + x2.astype(jnp.float32)
    mean = jnp.mean(x, axis=-1, keepdims=True)
    var = jnp.mean((x - mean) ** 2, axis=-1, keepdims=True)
    ln = (x - mean) * lax.rsqrt(var + EPS) * gamma.astype(jnp.float32) \
        + beta.astype(jnp.float32)
    return x, ln @ w.astype(jnp.float32) + b.astype(jnp.float32)


if __name__ == "__main__":
    key = jax.random.PRNGKey(0)
    k1, k2, k3 = jax.random.split(key, 3)

    # --- Test 1: f32, small non-128-aligned dims, explicit f32 MXU path. -----
    B, M, N, D = 2, 8, 32, 32
    x1 = jax.random.normal(k1, (B, M, N), dtype=jnp.float32)
    x2 = jax.random.normal(k2, (B, M, N), dtype=jnp.float32)
    # Parameter init mirroring the PyTorch module:
    #   w ~ Normal(std=0.02), b = 0, gamma = 1, beta = 0.
    w = 0.02 * jax.random.normal(k3, (N, D), dtype=jnp.float32)
    b = jnp.zeros((D,), jnp.float32)
    gamma = jnp.ones((N,), jnp.float32)
    beta = jnp.zeros((N,), jnp.float32)

    out_add, out = add_ln_matmul(x1, x2, w, b, gamma, beta,
                                 matmul_dtype=jnp.float32)
    jax.block_until_ready((out_add, out))
    ref_add, ref_out = _reference(x1, x2, w, b, gamma, beta)
    assert out_add.shape == (B, M, N) and out.shape == (B, M, D)
    assert jnp.allclose(out_add, ref_add, atol=1e-5, rtol=1e-5)
    assert jnp.allclose(out, ref_out, atol=1e-4, rtol=1e-4)

    # --- Test 2: bf16 inputs, lane-dense dims, default bf16 MXU path. --------
    B2, M2, N2, D2 = 2, 16, 128, 256
    x1b = jax.random.normal(k1, (B2, M2, N2), dtype=jnp.float32).astype(jnp.bfloat16)
    x2b = jax.random.normal(k2, (B2, M2, N2), dtype=jnp.float32).astype(jnp.bfloat16)
    wb = (0.02 * jax.random.normal(k3, (N2, D2), dtype=jnp.float32)).astype(jnp.bfloat16)
    bb = jnp.zeros((D2,), jnp.bfloat16)
    gammab = jnp.ones((N2,), jnp.bfloat16)
    betab = jnp.zeros((N2,), jnp.bfloat16)

    out_add_b, out_b = add_ln_matmul(x1b, x2b, wb, bb, gammab, betab)
    jax.block_until_ready((out_add_b, out_b))
    ref_add_b, ref_out_b = _reference(x1b, x2b, wb, bb, gammab, betab)
    assert jnp.allclose(out_add_b.astype(jnp.float32), ref_add_b, atol=5e-2, rtol=5e-2)
    assert jnp.allclose(out_b.astype(jnp.float32), ref_out_b, atol=5e-2, rtol=5e-2)

    # --- Test 3: f32 inputs, aligned shapes (no-pad fast path), default bf16
    #     MXU with f32 accumulation; hoisted weight prep reused across calls. --
    B3, M3, N3, D3 = 2, 8, 256, 128
    x1c = jax.random.normal(k1, (B3, M3, N3), dtype=jnp.float32)
    x2c = jax.random.normal(k2, (B3, M3, N3), dtype=jnp.float32)
    wc = 0.02 * jax.random.normal(k3, (N3, D3), dtype=jnp.float32)
    bc = jnp.zeros((D3,), jnp.float32)
    gammac = jnp.ones((N3,), jnp.float32)
    betac = jnp.zeros((N3,), jnp.float32)

    block = AddLnMatmulTPU(wc, bc, gammac, betac)       # params padded/cast once
    out_add_c, out_c = block(x1c, x2c)
    out_add_c2, out_c2 = block(x1c * 0.5, x2c * 0.5)    # reuse prepared weights
    jax.block_until_ready((out_add_c, out_c, out_add_c2, out_c2))
    ref_add_c, ref_out_c = _reference(x1c, x2c, wc, bc, gammac, betac)
    assert jnp.allclose(out_add_c, ref_add_c, atol=1e-5, rtol=1e-5)
    # bf16 MXU operands for f32 inputs -> loosened tolerance (documented tradeoff).
    assert jnp.allclose(out_c, ref_out_c, atol=3e-2, rtol=3e-2)

    print("KERNEL_OK")
</pallas_src>

<mosaic_0001>
module attributes {stable_mosaic.version = 11 : i64} {
  func.func @kernel(%arg0: i32, %arg1: i32, %arg2: memref<16x128xf32, #tpu.memory_space<vmem>>, %arg3: memref<16x128xf32, #tpu.memory_space<vmem>>, %arg4: memref<128x128xf32, #tpu.memory_space<vmem>>, %arg5: memref<1x128xf32, #tpu.memory_space<vmem>>, %arg6: memref<1x128xf32, #tpu.memory_space<vmem>>, %arg7: memref<1x128xf32, #tpu.memory_space<vmem>>, %arg8: memref<16x128xf32, #tpu.memory_space<vmem>>, %arg9: memref<16x128xf32, #tpu.memory_space<vmem>>, %arg10: memref<16x128xf32, #tpu.memory_space<vmem>>) attributes {dimension_semantics = [#tpu.dimension_semantics<parallel>, #tpu.dimension_semantics<arbitrary>], iteration_bounds = array<i64: 1, 1>, scalar_prefetch = 0 : i64, scratch_operands = 1 : i64, tpu.core_type = #tpu.core_type<tc>, window_params = [{transform_indices = @transform_0, window_bounds = array<i64: 16, 128>}, {transform_indices = @transform_1, window_bounds = array<i64: 16, 128>}, {transform_indices = @transform_2, window_bounds = array<i64: 128, 128>}, {pipeline_mode = #tpu.pipeline_mode<synchronous>, transform_indices = @transform_3, window_bounds = array<i64: 1, 128>}, {pipeline_mode = #tpu.pipeline_mode<synchronous>, transform_indices = @transform_4, window_bounds = array<i64: 1, 128>}, {pipeline_mode = #tpu.pipeline_mode<synchronous>, transform_indices = @transform_5, window_bounds = array<i64: 1, 128>}, {transform_indices = @transform_6, window_bounds = array<i64: 16, 128>}, {transform_indices = @transform_7, window_bounds = array<i64: 16, 128>}]} {
    %c0_i32 = arith.constant 0 : i32
    %0 = arith.cmpi eq, %arg1, %c0_i32 : i32
    %1 = arith.extui %0 : i1 to i32
    %c0_i32_0 = arith.constant 0 : i32
    %2 = arith.cmpi ne, %1, %c0_i32_0 : i32
    scf.if %2 {
      %c0_7 = arith.constant 0 : index
      %c0_8 = arith.constant 0 : index
      %13 = vector.load %arg2[%c0_7, %c0_8] : memref<16x128xf32, #tpu.memory_space<vmem>>, vector<16x128xf32>
      %c0_9 = arith.constant 0 : index
      %c0_10 = arith.constant 0 : index
      %14 = vector.load %arg3[%c0_9, %c0_10] : memref<16x128xf32, #tpu.memory_space<vmem>>, vector<16x128xf32>
      %15 = arith.addf %13, %14 : vector<16x128xf32>
      %c0_11 = arith.constant 0 : index
      %c0_12 = arith.constant 0 : index
      %16 = vector.load %arg8[%c0_11, %c0_12] : memref<16x128xf32, #tpu.memory_space<vmem>>, vector<16x128xf32>
      tpu.vector_store %arg8[%c0_11, %c0_12], %15 {strides = array<i32>} : memref<16x128xf32, #tpu.memory_space<vmem>>, vector<16x128xf32>,
      %cst_13 = arith.constant dense<0.000000e+00> : vector<16xf32>
      %17 = vector.multi_reduction <add>, %15, %cst_13 [1] : vector<16x128xf32> to vector<16xf32>
      %18 = vector.shape_cast %17 : vector<16xf32> to vector<16x1xf32>
      %19 = arith.mulf %15, %15 : vector<16x128xf32>
      %cst_14 = arith.constant dense<0.000000e+00> : vector<16xf32>
      %20 = vector.multi_reduction <add>, %19, %cst_14 [1] : vector<16x128xf32> to vector<16xf32>
      %21 = vector.shape_cast %20 : vector<16xf32> to vector<16x1xf32>
      %cst_15 = arith.constant 3.125000e-02 : f32
      %22 = vector.broadcast %cst_15 : f32 to vector<16x1xf32>
      %23 = arith.mulf %18, %22 : vector<16x1xf32>
      %cst_16 = arith.constant 3.125000e-02 : f32
      %24 = vector.broadcast %cst_16 : f32 to vector<16x1xf32>
      %25 = arith.mulf %21, %24 : vector<16x1xf32>
      %26 = arith.mulf %23, %23 : vector<16x1xf32>
      %27 = arith.subf %25, %26 : vector<16x1xf32>
      %cst_17 = arith.constant 9.99999974E-6 : f32
      %28 = vector.broadcast %cst_17 : f32 to vector<16x1xf32>
      %29 = arith.addf %27, %28 : vector<16x1xf32>
      %30 = math.rsqrt %29 : vector<16x1xf32>
      %c0_18 = arith.constant 0 : index
      %c0_19 = arith.constant 0 : index
      %31 = vector.load %arg5[%c0_18, %c0_19] : memref<1x128xf32, #tpu.memory_space<vmem>>, vector<1x128xf32>
      %c0_20 = arith.constant 0 : index
      %c0_21 = arith.constant 0 : index
      %32 = vector.load %arg6[%c0_20, %c0_21] : memref<1x128xf32, #tpu.memory_space<vmem>>, vector<1x128xf32>
      %33 = vector.broadcast %23 : vector<16x1xf32> to vector<16x128xf32>
      %34 = arith.subf %15, %33 : vector<16x128xf32>
      %35 = vector.broadcast %30 : vector<16x1xf32> to vector<16x128xf32>
      %36 = arith.mulf %34, %35 : vector<16x128xf32>
      %37 = vector.broadcast %31 : vector<1x128xf32> to vector<16x128xf32>
      %38 = arith.mulf %36, %37 : vector<16x128xf32>
      %39 = vector.broadcast %32 : vector<1x128xf32> to vector<16x128xf32>
      %40 = arith.addf %38, %39 : vector<16x128xf32>
      %c0_22 = arith.constant 0 : index
      %c0_23 = arith.constant 0 : index
      %41 = vector.load %arg10[%c0_22, %c0_23] : memref<16x128xf32, #tpu.memory_space<vmem>>, vector<16x128xf32>
      tpu.vector_store %arg10[%c0_22, %c0_23], %40 {strides = array<i32>} : memref<16x128xf32, #tpu.memory_space<vmem>>, vector<16x128xf32>,
    } else {
    }
    %c0 = arith.constant 0 : index
    %c0_1 = arith.constant 0 : index
    %3 = vector.load %arg10[%c0, %c0_1] : memref<16x128xf32, #tpu.memory_space<vmem>>, vector<16x128xf32>
    %c0_2 = arith.constant 0 : index
    %c0_3 = arith.constant 0 : index
    %4 = vector.load %arg4[%c0_2, %c0_3] : memref<128x128xf32, #tpu.memory_space<vmem>>, vector<128x128xf32>
    %cst = arith.constant dense<0.000000e+00> : vector<16x128xf32>
    %5 = tpu.matmul %3, %4, %cst {dimension_numbers = #tpu.dot_dimension_numbers<[1], [0], [0], [1], [0, 0, 1, 1], [], []>} : vector<16x128xf32>, vector<128x128xf32>, vector<16x128xf32> -> vector<16x128xf32>
    %c128_i32 = arith.constant 128 : i32
    %6 = arith.muli %arg1, %c128_i32 : i32
    %7 = tpu.assume_multiple %6, 128 : i32
    %c0_4 = arith.constant 0 : index
    %8 = arith.index_cast %7 : i32 to index
    %9 = vector.load %arg7[%c0_4, %8] : memref<1x128xf32, #tpu.memory_space<vmem>>, vector<1x128xf32>
    %10 = vector.broadcast %9 : vector<1x128xf32> to vector<16x128xf32>
    %11 = arith.addf %5, %10 : vector<16x128xf32>
    %c0_5 = arith.constant 0 : index
    %c0_6 = arith.constant 0 : index
    %12 = vector.load %arg9[%c0_5, %c0_6] : memref<16x128xf32, #tpu.memory_space<vmem>>, vector<16x128xf32>
    tpu.vector_store %arg9[%c0_5, %c0_6], %11 {strides = array<i32>} : memref<16x128xf32, #tpu.memory_space<vmem>>, vector<16x128xf32>,
    return
  }
  func.func @transform_0(%arg0: i32, %arg1: i32) -> (i32, i32) {
    %c0_i32 = arith.constant 0 : i32
    %c0_i32_0 = arith.constant 0 : i32
    return %arg0, %c0_i32 : i32, i32
  }
  func.func @transform_1(%arg0: i32, %arg1: i32) -> (i32, i32) {
    %c0_i32 = arith.constant 0 : i32
    %c0_i32_0 = arith.constant 0 : i32
    return %arg0, %c0_i32 : i32, i32
  }
  func.func @transform_2(%arg0: i32, %arg1: i32) -> (i32, i32) {
    %c0_i32 = arith.constant 0 : i32
    %c0_i32_0 = arith.constant 0 : i32
    return %c0_i32, %arg1 : i32, i32
  }
  func.func @transform_3(%arg0: i32, %arg1: i32) -> (i32, i32) {
    %c0_i32 = arith.constant 0 : i32
    %c0_i32_0 = arith.constant 0 : i32
    %c0_i32_1 = arith.constant 0 : i32
    return %c0_i32, %c0_i32_0 : i32, i32
  }
  func.func @transform_4(%arg0: i32, %arg1: i32) -> (i32, i32) {
    %c0_i32 = arith.constant 0 : i32
    %c0_i32_0 = arith.constant 0 : i32
    %c0_i32_1 = arith.constant 0 : i32
    return %c0_i32, %c0_i32_0 : i32, i32
  }
  func.func @transform_5(%arg0: i32, %arg1: i32) -> (i32, i32) {
    %c0_i32 = arith.constant 0 : i32
    %c0_i32_0 = arith.constant 0 : i32
    %c0_i32_1 = arith.constant 0 : i32
    return %c0_i32, %c0_i32_0 : i32, i32
  }
  func.func @transform_6(%arg0: i32, %arg1: i32) -> (i32, i32) {
    %c0_i32 = arith.constant 0 : i32
    %c0_i32_0 = arith.constant 0 : i32
    return %arg0, %c0_i32 : i32, i32
  }
  func.func @transform_7(%arg0: i32, %arg1: i32) -> (i32, i32) {
    %c0_i32 = arith.constant 0 : i32
    return %arg0, %arg1 : i32, i32
  }
}

</mosaic_0001>

<bundles_post_ra>
// kernel: tpu_custom_call.1
= control target key start
LH: loop header
LB: loop body
LE: loop exit
PB: predicated region body
PF: predicated region fallthrough
CT: control target
= control target key end

     0   :  { %13 = vsyncpa [#allocation4], 0  ;;  %s542_s0 = inlined_call_operand.hbm [shape: f32[16,128], index: 0, kind: input, shape index: {}]   ;;  %s543_s1 = inlined_call_operand.hbm [shape: f32[16,128], index: 1, kind: input, shape index: {}]   ;;  %s544_s2 = inlined_call_operand.hbm [shape: f32[128,128], index: 2, kind: input, shape index: {}]   ;;  %s545_s3 = inlined_call_operand.vmem [shape: f32[1,128], index: 3, kind: input, shape index: {}]   ;;  %s546_s4 = inlined_call_operand.vmem [shape: f32[1,128], index: 4, kind: input, shape index: {}]   ;;  %s547_s5 = inlined_call_operand.vmem [shape: f32[1,128], index: 5, kind: input, shape index: {}]   ;;  %s548_s6 = inlined_call_operand.hbm [shape: f32[16,128], index: 6, kind: output, shape index: {0}]   ;;  %s549_s7 = inlined_call_operand.hbm [shape: f32[16,128], index: 7, kind: output, shape index: {1}]  }
   0x1   :  { %14 = vsyncpa [#allocation7], 0 }
   0x2   :  { %15 = vsyncpa [#allocation5], 0 }
   0x3   :  { %16 = vsyncpa [#allocation11], 0  ;;  %s442_s24 = smov [#allocation6]   ;;  %s443_s26 = smov [#allocation3]  }
   0x4   :  { %s34_s25 = sshll.u32 %s442_s24, 4  ;;  %s22_s27 = sshll.u32 %s443_s26, 4  ;;  %s35_s25 = int_to_ptr.vmem [resolvable:$true] %s34_s25  ;;  %s23_s27 = int_to_ptr.vmem [resolvable:$true] %s22_s27 }
   0x5   :  { %s342_s28 = scalar_lea.vmem %s35_s25, 256  ;;  %p347_p1 = scmp.lt.s32.totalorder %s35_s25, %s35_s25 }
   0x6   :  { %p343_p0 = scmp.ne.s32.totalorder %s35_s25, %s342_s28  ;;  %p348_p2 = scmp.lt.s32.totalorder %s342_s28, %s342_s28 }
   0x8   :  { %p349_p3 = por %p348_p2, %p347_p1 }
   0xa   :  { %p350_p4 = pnand %p349_p3, %p343_p0 }
   0xc   :  { %353 = shalt.err (!%p350_p4)
}
   0xd   :  { %s444_s29 = smov 128   ;;  %s445_s30 = smov 8  }
   0xe   :  { %40 = dma.hbm_to_vmem [thread:$0]  %s543_s1, 256, %s35_s25, [#allocation7], %s444_s29, %s444_s29, %s445_s30  }
   0xf   :  { %s362_s10 = scalar_lea.vmem %s23_s27, 256  ;;  %p367_p6 = scmp.lt.s32.totalorder %s23_s27, %s23_s27 }
  0x10   :  { %p363_p5 = scmp.ne.s32.totalorder %s23_s27, %s362_s10  ;;  %p368_p7 = scmp.lt.s32.totalorder %s362_s10, %s362_s10 }
  0x12   :  { %p369_p8 = por %p368_p7, %p367_p6 }
  0x14   :  { %p370_p9 = pnand %p369_p8, %p363_p5 }
  0x16   :  { %373 = shalt.err (!%p370_p9)
}
  0x17   :  { %28 = dma.hbm_to_vmem [thread:$0]  %s542_s0, 256, %s23_s27, [#allocation4], %s444_s29, %s444_s29, %s445_s30  }
  0x18   :  { %s446_s13 = smov [#allocation8]  }
  0x19   :  { %s46_s14 = sshll.u32 %s446_s13, 4  ;;  %s47_s14 = int_to_ptr.vmem [resolvable:$true] %s46_s14 }
  0x1a   :  { %s382_s15 = scalar_lea.vmem %s47_s14, 2048  ;;  %p387_p11 = scmp.lt.s32.totalorder %s47_s14, %s47_s14 }
  0x1b   :  { %p383_p10 = scmp.ne.s32.totalorder %s47_s14, %s382_s15  ;;  %p388_p12 = scmp.lt.s32.totalorder %s382_s15, %s382_s15 }
  0x1d   :  { %p389_p13 = por %p388_p12, %p387_p11 }
  0x1f   :  { %p390_p0 = pnand %p389_p13, %p383_p10 }
  0x21   :  { %393 = shalt.err (!%p390_p0)
}
  0x22   :  { %52 = dma.hbm_to_vmem [thread:$0]  %s544_s2, 2048, %s47_s14, [#allocation7], %s444_s29, %s444_s29, %s445_s30  }
  0x23   :  { %434 = dma.done.wait [#allocation4], 256  }
  0x24   :  { %435 = vsyncadd [#allocation4], 4294967040 }
  0x25   :  { %436 = dma.done.wait [#allocation7], 2304  }
  0x26   :  { %437 = vsyncadd [#allocation7], 4294964992  ;;  %v72_v0 = vld [vmem:[#allocation3] sm:$0xff]  ;;  %v74_v1 = vld [vmem:[#allocation6] sm:$0xff]  ;;  %s447_s19 = smov [#allocation9]  }
  0x27   :  { %v73_v2 = vld [vmem:[#allocation3 + $0x8] sm:$0xff]  ;;  %v507_v3 = vadd.f32 %v74_v1, %v72_v0  ;;  %v75_v4 = vld [vmem:[#allocation6 + $0x8] sm:$0xff]  ;;  %v142_v9 = vld [vmem:[#allocation8 + $0x70] sm:$0xff]  ;;  %s237_s20 = sshll.u32 %s447_s19, 4  ;;  %s238_s20 = int_to_ptr.vmem [resolvable:$true] %s237_s20 }
  0x28   :  { %v509_v5 = vadd.f32 %v75_v4, %v73_v2  ;;  %v143_v8 = vld [vmem:[#allocation8 + $0x78] sm:$0xff]  ;;  %v141_v10 = vld [vmem:[#allocation8 + $0x68] sm:$0xff]  ;;  %v140_v11 = vld [vmem:[#allocation8 + $0x60] sm:$0xff]  ;;  %s394_s21 = scalar_lea.vmem %s238_s20, 256  ;;  %p399_p2 = scmp.lt.s32.totalorder %s238_s20, %s238_s20 }
  0x29   :  { %80 = vadd.xlane.f32.xlu0 %v507_v3  ;;  %78 = vst [vmem:[#allocation9] sm:$0xff] %v507_v3  ;;  %v84_v6 = vmul.f32 %v507_v3, %v507_v3  ;;  %288 = vmatprep.subr.mxu0 %v143_v8  ;;  %v139_v12 = vld [vmem:[#allocation8 + $0x58] sm:$0xff]  ;;  %v138_v13 = vld [vmem:[#allocation8 + $0x50] sm:$0xff]  ;;  %v137_v14 = vld [vmem:[#allocation8 + $0x48] sm:$0xff]  ;;  %p395_p1 = scmp.ne.s32.totalorder %s238_s20, %s394_s21  ;;  %p400_p3 = scmp.lt.s32.totalorder %s394_s21, %s394_s21 }
  0x2a   :  { %79 = vst [vmem:[#allocation9 + $0x8] sm:$0xff] %v509_v5  ;;  %v85_v7 = vmul.f32 %v509_v5, %v509_v5  ;;  %289 = vmatpush3.msra.mxu0 %v143_v8  ;;  %v136_v15 = vld [vmem:[#allocation8 + $0x40] sm:$0xff]  ;;  %v135_v16 = vld [vmem:[#allocation8 + $0x38] sm:$0xff]  ;;  %v134_v17 = vld [vmem:[#allocation8 + $0x30] sm:$0xff] }
  0x2b   :  { %86 = vadd.xlane.f32.xlu1 %v84_v6  ;;  %290 = vmatprep.subr.mxu0 %v142_v9  ;;  %v133_v18 = vld [vmem:[#allocation8 + $0x28] sm:$0xff]  ;;  %v132_v19 = vld [vmem:[#allocation8 + $0x20] sm:$0xff]  ;;  %v131_v20 = vld [vmem:[#allocation8 + $0x18] sm:$0xff]  ;;  %p401_p4 = por %p400_p3, %p399_p2 }
  0x2c   :  { %291 = vmatpush3.msra.mxu0 %v142_v9  ;;  %v130_v21 = vld [vmem:[#allocation8 + $0x10] sm:$0xff]  ;;  %v129_v22 = vld [vmem:[#allocation8 + $0x8] sm:$0xff]  ;;  %v128_v23 = vld [vmem:[#allocation8] sm:$0xff] }
  0x2d   :  { %82 = vadd.xlane.f32.xlu0 %v509_v5  ;;  %292 = vmatprep.subr.mxu0 %v141_v10  ;;  %v267_v40 = vld [vmem:[%s545_s3] ss:$0 sm:$0xff]  ;;  %p402_p5 = pnand %p401_p4, %p395_p1 }
  0x2e   :  { %293 = vmatpush3.msra.mxu0 %v141_v10  ;;  %v268_v42 = vld [vmem:[%s546_s4] ss:$0 sm:$0xff] }
  0x2f   :  { %88 = vadd.xlane.f32.xlu1 %v85_v7  ;;  %294 = vmatprep.subr.mxu0 %v140_v11 }
  0x30   :  { %295 = vmatpush3.msra.mxu0 %v140_v11 }
  0x31   :  { %296 = vmatprep.subr.mxu0 %v139_v12 }
  0x32   :  { %297 = vmatpush3.msra.mxu0 %v139_v12 }
  0x33   :  { %298 = vmatprep.subr.mxu0 %v138_v13 }
  0x34   :  { %299 = vmatpush3.msra.mxu0 %v138_v13 }
  0x35   :  { %300 = vmatprep.subr.mxu0 %v137_v14 }
  0x36   :  { %301 = vmatpush3.msra.mxu0 %v137_v14 }
  0x37   :  { %302 = vmatprep.subr.mxu0 %v136_v15 }
  0x38   :  { %303 = vmatpush3.msra.mxu0 %v136_v15 }
  0x39   :  { %304 = vmatprep.subr.mxu0 %v135_v16 }
  0x3a   :  { %305 = vmatpush3.msra.mxu0 %v135_v16 }
  0x3b   :  { %306 = vmatprep.subr.mxu0 %v134_v17 }
  0x3c   :  { %307 = vmatpush3.msra.mxu0 %v134_v17 }
  0x3d   :  { %308 = vmatprep.subr.mxu0 %v133_v18 }
  0x3e   :  { %309 = vmatpush3.msra.mxu0 %v133_v18 }
  0x3f   :  { %310 = vmatprep.subr.mxu0 %v132_v19 }
  0x40   :  { %311 = vmatpush3.msra.mxu0 %v132_v19 }
  0x41   :  { %312 = vmatprep.subr.mxu0 %v131_v20 }
  0x42   :  { %313 = vmatpush3.msra.mxu0 %v131_v20 }
  0x43   :  { %314 = vmatprep.subr.mxu0 %v130_v21 }
  0x44   :  { %315 = vmatpush3.msra.mxu0 %v130_v21 }
  0x45   :  { %316 = vmatprep.subr.mxu0 %v129_v22 }
  0x46   :  { %317 = vmatpush3.msra.mxu0 %v129_v22 }
  0x47   :  { %318 = vmatprep.subr.mxu0 %v128_v23 }
  0x48   :  { %319 = vmatpush3.msra.mxu0 %v128_v23 }
  0xb2   :  { %v81_v24 = vpop.xlane.xlu0 %80 }
  0xb3   :  { %v90_v25 = vmul.f32 0.03125, %v81_v24 }
  0xb4   :  { %v87_v26 = vpop.xlane.xlu1 %86 }
  0xb5   :  { %v94_v27 = vmul.f32 %v90_v25, %v90_v25  ;;  %v92_v28 = vmul.f32 0.03125, %v87_v26  ;;  %v104_v38 = vsub.f32 %v507_v3, %v90_v25 }
  0xb6   :  { %v83_v29 = vpop.xlane.xlu0 %82 }
  0xb7   :  { %v96_v30 = vsub.f32 %v92_v28, %v94_v27  ;;  %v91_v31 = vmul.f32 0.03125, %v83_v29 }
  0xb8   :  { %v89_v32 = vpop.xlane.xlu1 %88 }
  0xb9   :  { %v98_v33 = vadd.f32 1e-05, %v96_v30  ;;  %v95_v34 = vmul.f32 %v91_v31, %v91_v31  ;;  %v93_v35 = vmul.f32 0.03125, %v89_v32  ;;  %v105_v43 = vsub.f32 %v509_v5, %v91_v31 }
  0xbb   :  { %330 = vrsqrt.f32 %v98_v33  ;;  %v97_v36 = vsub.f32 %v93_v35, %v95_v34 }
  0xbd   :  { %v99_v37 = vadd.f32 1e-05, %v97_v36 }
  0xbf   :  { %332 = vrsqrt.f32 %v99_v37 }
  0xc8   :  { %v331_v39 = vpop.eup %330 }
  0xc9   :  { %v106_v41 = vmul.f32 %v331_v39, %v104_v38 }
  0xcb   :  { %v114_v44 = vmul.f32 %v267_v40, %v106_v41 }
  0xcc   :  { %v333_v45 = vpop.eup %332 }
  0xcd   :  { %v107_v46 = vmul.f32 %v333_v45, %v105_v43  ;;  %v122_v47 = vadd.f32 %v268_v42, %v114_v44 }
  0xcf   :  { %v115_v48 = vmul.f32 %v267_v40, %v107_v46  ;;  %320 = vmatprep.mubr.f32.mxu0 %v122_v47 }
  0xd1   :  { %v123_v49 = vadd.f32 %v268_v42, %v115_v48 }
  0xd3   :  { %321 = vmatmul.mubr.f32.vlgmr.msra.gmra.mxu0 %v123_v49 }
  0xd4   :  { %405 = shalt.err (!%p402_p5)
}
  0xd5   :  { %243 = dma.vmem_to_hbm [thread:$0]  %s238_s20, 256, %s548_s6, [#allocation5], %s444_s29, %s444_s29, %s445_s30  }
  0xd6   :  { %v269_v50 = vld [vmem:[%s547_s5] ss:$0 sm:$0xff]  ;;  %s448_s24 = smov [#allocation10]  }
  0xd7   :  { %s249_s25 = sshll.u32 %s448_s24, 4  ;;  %s250_s25 = int_to_ptr.vmem [resolvable:$true] %s249_s25 }
  0xd8   :  { %s414_s26 = scalar_lea.vmem %s250_s25, 256  ;;  %p419_p7 = scmp.lt.s32.totalorder %s250_s25, %s250_s25 }
  0xd9   :  { %p415_p6 = scmp.ne.s32.totalorder %s250_s25, %s414_s26  ;;  %p420_p8 = scmp.lt.s32.totalorder %s414_s26, %s414_s26 }
  0xdb   :  { %p421_p9 = por %p420_p8, %p419_p7 }
  0xdd   :  { %p422_p10 = pnand %p421_p9, %p415_p6 }
 0x193   :  { %v322_v51 = vpop.f32.mrf.mxu0 }
 0x194   :  { %v227_v52 = vadd.f32 %v322_v51, %v269_v50 }
 0x195   :  { %v221_v53 = vpop.f32.mrf.mxu0 }
 0x196   :  { %231 = vst [vmem:[#allocation10 + $0x8] sm:$0xff] %v227_v52  ;;  %v222_v54 = vadd.f32 %v269_v50, %v221_v53 }
 0x198   :  { %230 = vst [vmem:[#allocation10] sm:$0xff] %v222_v54 }
 0x199   :  { %425 = shalt.err (!%p422_p10)
}
 0x19a   :  { %255 = dma.vmem_to_hbm [thread:$0]  %s250_s25, 256, %s549_s7, [#allocation11], %s444_s29, %s444_s29, %s445_s30  }
 0x19b   :  { %438 = dma.done.wait [#allocation5], 256  }
 0x19c   :  { %439 = vsyncadd [#allocation5], 4294967040 }
 0x19d   :  { %440 = dma.done.wait [#allocation11], 256  }
 0x19e   :  { %441 = vsyncadd [#allocation11], 4294967040 }
 0x19f   :  { %262 = vsyncpa [#allocation4], 1 }
 0x1a0   :  { %263 = vsyncpa [#allocation7], 1 }
 0x1a1   :  { %264 = vsyncpa [#allocation5], 1 }
 0x1a2   :  { %265 = vsyncpa [#allocation11], 1 }

</bundles_post_ra>
